<compile_context>
chip_gen: v7x
topology: tpu7x:2x2x1
jax: 0.10.0
libtpu: 0.0.40
codegen_flags: <defaults>
</compile_context>

<pallas_src>
import functools

import jax
import jax.numpy as jnp
from jax.experimental import pallas as pl
from jax.experimental.pallas import tpu as pltpu

# consts.MLP_LEAKY_SLOPE is not available here.  NOTE: PyTorch's nn.LeakyReLU
# default is 0.01; override via `slope=` if the reference model uses another value.
# TODO(synk): confirm consts.MLP_LEAKY_SLOPE from the original repo.
MLP_LEAKY_SLOPE = 0.2


def _round_up(x: int, m: int) -> int:
    return (x + m - 1) // m * m


def _cdiv(a: int, b: int) -> int:
    return (a + b - 1) // b


# --------------------------------------------------------------------------- #
# Kernels
# --------------------------------------------------------------------------- #
def _mlp_kernel(x_ref, w_ref, b_ref, o_ref, *, slope):
    # x:[tm,Din]  w:[Din,tn]  b:[1,tn] (f32)  o:[tm,tn]
    y = jnp.dot(x_ref[...], w_ref[...], preferred_element_type=jnp.float32)
    y = y + b_ref[...]
    # LeakyReLU via a single vmax (valid for 0 < slope < 1).
    o_ref[...] = jnp.maximum(y, slope * y).astype(o_ref.dtype)


def _mlp_kernel_ksplit(x_ref, w_ref, b_ref, o_ref, acc_ref, *, slope):
    # Grid axes: (i rows, j cols, k reduction).  k is innermost / "arbitrary";
    # the output block index is constant over k so acc_ref stays resident.
    @pl.when(pl.program_id(2) == 0)
    def _init():
        acc_ref[...] = jnp.zeros_like(acc_ref)

    acc_ref[...] += jnp.dot(x_ref[...], w_ref[...],
                            preferred_element_type=jnp.float32)

    @pl.when(pl.program_id(2) == pl.num_programs(2) - 1)
    def _store():
        y = acc_ref[...] + b_ref[...]
        o_ref[...] = jnp.maximum(y, slope * y).astype(o_ref.dtype)


# --------------------------------------------------------------------------- #
# Wrapper
# --------------------------------------------------------------------------- #
def shared_mlp(x, w, b, *, slope=MLP_LEAKY_SLOPE, compute_dtype=None,
               out_dtype=None):
    """y = LeakyReLU(x @ w + b).  x: (..., Din), w: (Din, Dout), b: (Dout,)."""
    din, dout = w.shape
    lead = x.shape[:-1]
    out_dtype = jnp.dtype(out_dtype or x.dtype)

    x2d = x.reshape(-1, din)
    n = x2d.shape[0]

    # Optional low-precision operands (accumulation / bias / activation stay f32).
    op_dtype = jnp.dtype(compute_dtype) if compute_dtype is not None else jnp.dtype(x.dtype)
    if x2d.dtype != op_dtype:
        x2d = x2d.astype(op_dtype)
    w_c = w.astype(op_dtype) if w.dtype != op_dtype else w
    ix = op_dtype.itemsize
    io = out_dtype.itemsize

    # ---- per-generation VMEM budget (v7x: 64 MiB physical; v5e/v6e: 128 MiB) ---
    try:
        vmem_cap = int(pltpu.get_tpu_info().vmem_capacity_bytes)
    except Exception:
        vmem_cap = 64 << 20            # conservative: valid on every generation
    vmem_budget = max(24 << 20, min(vmem_cap - (8 << 20), 112 << 20))

    def step_bytes(tm_, tn_, tk_, acc):
        # double-buffered x / w / out tiles (+ f32 accumulator when K-split)
        return (2 * tm_ * tk_ * ix + 2 * tk_ * tn_ * ix
                + 2 * tm_ * tn_ * io + (tm_ * tn_ * 4 if acc else 0))

    # ---- column (Dout) tiling: lane-dense, weight-resident when it fits -------
    dout128 = _round_up(dout, 128)
    if step_bytes(256, dout128, din, False) <= vmem_budget // 2:
        tn = dout128                   # one j block: W & bias pinned in VMEM
    else:
        tn = min(512, dout128)
    dout_pad = _round_up(dout128, tn)  # W/bias padded so weight reads stay in-bounds

    # ---- K (Din) split only when untiled Din would blow the VMEM budget -------
    tk = din
    if step_bytes(256, tn, din, False) > vmem_budget // 2 and din % 128 == 0:
        tk = 128
        for cand in range(din - 128, 127, -128):
            if din % cand == 0 and step_bytes(256, tn, cand, True) <= vmem_budget // 2:
                tk = cand
                break
    ksplit = tk != din

    # ---- row (M) tile: target ~8-16 MiB double-buffered working set ------------
    target = min(16 << 20, vmem_budget // 3)
    fixed = 2 * tk * tn * ix
    per_row = 2 * tk * ix + 2 * tn * io + (tn * 4 if ksplit else 0)
    tm = max(target - fixed, per_row) // per_row
    tm = max(8, min(tm, 4096, _round_up(n, 8)))
    tm = (tm // 256) * 256 if tm >= 256 else _round_up(tm, 8)

    # Megacore: make sure the "parallel" axes have at least 2 blocks.
    ni = _cdiv(n, tm)
    nj = dout_pad // tn
    if ni * nj < 2 and n > 8:
        tm = max(8, _round_up(_cdiv(tm, 2), 8))
        ni = _cdiv(n, tm)

    # ---- pad ONLY the (small) weight / bias columns; x and the output are not
    #      padded (cdiv row grid + masked boundary stores handle raggedness) -----
    if dout_pad != dout:
        w_c = jnp.pad(w_c, ((0, 0), (0, dout_pad - dout)))
        b_p = jnp.pad(b, ((0, dout_pad - dout),))
    else:
        b_p = b
    b2d = b_p.reshape(1, dout_pad).astype(jnp.float32)

    # ---- specs / grid -----------------------------------------------------------
    if not ksplit:
        kernel = functools.partial(_mlp_kernel, slope=float(slope))
        grid = (ni, nj)
        in_specs = [
            pl.BlockSpec((tm, din), lambda i, j: (i, 0)),   # x row tile
            pl.BlockSpec((din, tn), lambda i, j: (0, j)),   # weight col tile (resident if nj==1)
            pl.BlockSpec((1, tn), lambda i, j: (0, j)),     # bias col tile
        ]
        out_specs = pl.BlockSpec((tm, tn), lambda i, j: (i, j))
        scratch = []
        dims = ("parallel", "parallel")
    else:
        kernel = functools.partial(_mlp_kernel_ksplit, slope=float(slope))
        grid = (ni, nj, din // tk)
        in_specs = [
            pl.BlockSpec((tm, tk), lambda i, j, k: (i, k)),
            pl.BlockSpec((tk, tn), lambda i, j, k: (k, j)),
            pl.BlockSpec((1, tn), lambda i, j, k: (0, j)),
        ]
        out_specs = pl.BlockSpec((tm, tn), lambda i, j, k: (i, j))
        scratch = [pltpu.VMEM((tm, tn), jnp.float32)]
        dims = ("parallel", "parallel", "arbitrary")

    need = step_bytes(tm, tn, tk, ksplit) + (4 << 20)
    vmem_limit = int(min(max(need, 32 << 20), vmem_budget))

    cost = pl.CostEstimate(
        flops=2 * n * din * dout_pad,
        transcendentals=0,
        bytes_accessed=(n * din * ix + din * dout_pad * ix + dout_pad * 4
                        + n * dout * io),
    )

    out2d = pl.pallas_call(
        kernel,
        out_shape=jax.ShapeDtypeStruct((n, dout), out_dtype),
        grid_spec=pltpu.PrefetchScalarGridSpec(
            num_scalar_prefetch=0,
            grid=grid,
            in_specs=in_specs,
            out_specs=out_specs,
            scratch_shapes=scratch,
        ),
        compiler_params=pltpu.CompilerParams(
            dimension_semantics=dims,
            vmem_limit_bytes=vmem_limit,
        ),
        cost_estimate=cost,
    )(x2d, w_c, b2d)

    return out2d.reshape(*lead, dout)


def shared_mlp_ref(x, w, b, slope=MLP_LEAKY_SLOPE):
    y = jnp.einsum("...i,io->...o", x, w) + b
    return jnp.where(y > 0, y, slope * y)


if __name__ == "__main__":
    key = jax.random.PRNGKey(0)
    k_x, k_w, k_b, k_x2 = jax.random.split(key, 4)

    batch, seq, input_dim, output_dim = 2, 8, 32, 64

    # Deterministic parameter init mimicking nn.Linear (uniform +/- 1/sqrt(fan_in)).
    bound = 1.0 / jnp.sqrt(jnp.float32(input_dim))
    w = jax.random.uniform(k_w, (input_dim, output_dim), jnp.float32, -bound, bound)
    b = jax.random.uniform(k_b, (output_dim,), jnp.float32, -bound, bound)

    x = jax.random.normal(k_x, (batch, seq, input_dim), jnp.float32)

    # f32 path
    out = jax.block_until_ready(shared_mlp(x, w, b))
    ref = shared_mlp_ref(x, w, b)
    assert out.shape == (batch, seq, output_dim)
    assert jnp.allclose(out, ref, atol=1e-5, rtol=1e-5)

    # Ragged row count (exercises the cdiv row grid / masked boundary blocks).
    x_odd = jax.random.normal(k_x2, (3, 7, input_dim), jnp.float32)
    out_odd = jax.block_until_ready(shared_mlp(x_odd, w, b))
    ref_odd = shared_mlp_ref(x_odd, w, b)
    assert out_odd.shape == (3, 7, output_dim)
    assert jnp.allclose(out_odd, ref_odd, atol=1e-5, rtol=1e-5)

    # bf16-operand path (f32 accumulation + activation, f32 output).
    out_bf16 = jax.block_until_ready(
        shared_mlp(x, w, b, compute_dtype=jnp.bfloat16, out_dtype=jnp.float32))
    assert jnp.allclose(out_bf16, ref, atol=3e-2, rtol=3e-2)

    print("KERNEL_OK")
</pallas_src>

<mosaic_0001>
module attributes {stable_mosaic.version = 11 : i64} {
  func.func @_mlp_kernel(%arg0: i32, %arg1: i32, %arg2: memref<8x32xf32, #tpu.memory_space<vmem>>, %arg3: memref<32x128xf32, #tpu.memory_space<vmem>>, %arg4: memref<1x128xf32, #tpu.memory_space<vmem>>, %arg5: memref<8x128xf32, #tpu.memory_space<vmem>>) attributes {dimension_semantics = [#tpu.dimension_semantics<parallel>, #tpu.dimension_semantics<parallel>], iteration_bounds = array<i64: 2, 1>, scalar_prefetch = 0 : i64, scratch_operands = 0 : i64, tpu.core_type = #tpu.core_type<tc>, window_params = [{transform_indices = @transform_0, window_bounds = array<i64: 8, 32>}, {transform_indices = @transform_1, window_bounds = array<i64: 32, 128>}, {transform_indices = @transform_2, window_bounds = array<i64: 1, 128>}, {transform_indices = @transform_3, window_bounds = array<i64: 8, 128>}]} {
    %c0 = arith.constant 0 : index
    %c0_0 = arith.constant 0 : index
    %0 = vector.load %arg2[%c0, %c0_0] : memref<8x32xf32, #tpu.memory_space<vmem>>, vector<8x32xf32>
    %c0_1 = arith.constant 0 : index
    %c0_2 = arith.constant 0 : index
    %1 = vector.load %arg3[%c0_1, %c0_2] : memref<32x128xf32, #tpu.memory_space<vmem>>, vector<32x128xf32>
    %cst = arith.constant dense<0.000000e+00> : vector<8x128xf32>
    %2 = tpu.matmul %0, %1, %cst {dimension_numbers = #tpu.dot_dimension_numbers<[1], [0], [0], [1], [0, 0, 1, 1], [], []>} : vector<8x32xf32>, vector<32x128xf32>, vector<8x128xf32> -> vector<8x128xf32>
    %c0_3 = arith.constant 0 : index
    %c0_4 = arith.constant 0 : index
    %3 = vector.load %arg4[%c0_3, %c0_4] : memref<1x128xf32, #tpu.memory_space<vmem>>, vector<1x128xf32>
    %4 = vector.broadcast %3 : vector<1x128xf32> to vector<8x128xf32>
    %5 = arith.addf %2, %4 : vector<8x128xf32>
    %cst_5 = arith.constant 2.000000e-01 : f32
    %6 = vector.broadcast %cst_5 : f32 to vector<8x128xf32>
    %7 = arith.mulf %6, %5 : vector<8x128xf32>
    %8 = arith.maximumf %5, %7 : vector<8x128xf32>
    %c0_6 = arith.constant 0 : index
    %c0_7 = arith.constant 0 : index
    %9 = vector.load %arg5[%c0_6, %c0_7] : memref<8x128xf32, #tpu.memory_space<vmem>>, vector<8x128xf32>
    tpu.vector_store %arg5[%c0_6, %c0_7], %8 {strides = array<i32>} : memref<8x128xf32, #tpu.memory_space<vmem>>, vector<8x128xf32>,
    return
  }
  func.func @transform_0(%arg0: i32, %arg1: i32) -> (i32, i32) {
    %c0_i32 = arith.constant 0 : i32
    %c0_i32_0 = arith.constant 0 : i32
    return %arg0, %c0_i32 : i32, i32
  }
  func.func @transform_1(%arg0: i32, %arg1: i32) -> (i32, i32) {
    %c0_i32 = arith.constant 0 : i32
    %c0_i32_0 = arith.constant 0 : i32
    return %c0_i32, %arg1 : i32, i32
  }
  func.func @transform_2(%arg0: i32, %arg1: i32) -> (i32, i32) {
    %c0_i32 = arith.constant 0 : i32
    %c0_i32_0 = arith.constant 0 : i32
    return %c0_i32, %arg1 : i32, i32
  }
  func.func @transform_3(%arg0: i32, %arg1: i32) -> (i32, i32) {
    %c0_i32 = arith.constant 0 : i32
    return %arg0, %arg1 : i32, i32
  }
}

</mosaic_0001>

<bundles_post_ra>
// kernel: tpu_custom_call.1
= control target key start
LH: loop header
LB: loop body
LE: loop exit
PB: predicated region body
PF: predicated region fallthrough
CT: control target
= control target key end

     0   :  { %8 = vsyncpa [#allocation3], 0  ;;  %s952_s0 = inlined_call_operand.hbm [shape: f32[16,32], index: 0, kind: input, shape index: {}]   ;;  %s953_s1 = inlined_call_operand.hbm [shape: f32[32,128], index: 1, kind: input, shape index: {}]   ;;  %s954_s2 = inlined_call_operand.vmem [shape: f32[1,128], index: 2, kind: input, shape index: {}]   ;;  %s955_s3 = inlined_call_operand.hbm [shape: f32[16,64], index: 3, kind: output, shape index: {}]  }
   0x1   :  { %10 = vsyncpa [#allocation3 + $0x1], 0 }
   0x2   :  { %11 = vsyncpa [#allocation6], 0 }
   0x3   :  { %12 = vsyncpa [#allocation4], 0 }
   0x4   :  { %14 = vsyncpa [#allocation4 + $0x1], 0  ;;  %s735_s12 = smov 0   ;;  %s737_s13 = smov 0  }
   0x5   :  { %s739_s14 = smov 0   ;;  %s741_s15 = smov 0  }
   0x6   :  { %s743_s16 = smov 0   ;;  %s745_s17 = smov 0  }
   0x7 LB: > { %s443_s18 = sadd.s32 4294967295, %s705_s17   ;;  %s444_s19 = sadd.s32 4294967294, %s705_s17   ;;  %s705_s17 = sphi %s745_s17, %s20_s17   ;;  %s701_s16 = sphi %s743_s16, %s979_s16   ;;  %s697_s15 = sphi %s741_s15, %s978_s15   ;;  %s693_s14 = sphi %s739_s14, %s977_s14   ;;  %s689_s13 = sphi %s737_s13, %s976_s13   ;;  %s685_s12 = sphi %s735_s12, %s975_s12  }
   0x8   : > { %p52_p0 = scmp.ne.s32.totalorder %s689_s13, %s685_s12  ;;  %p769_p1 = scmp.eq.s32.totalorder %s443_s18, 0 }
   0x9   : > { %p773_p2 = scmp.eq.s32.totalorder %s443_s18, 1  ;;  %p136_p3 = scmp.eq.s32.totalorder %s444_s19, 1 }
   0xa   : > { %s960_s20 = scalar_select %p769_p1, 1, 0 }
   0xb   : > { %s961_s21 = scalar_select %p773_p2, 1, 0 }
   0xc   : > { %p779_p4 = por %p769_p1, %p52_p0  ;;  %p445_p5 = scmp.ge.s32.totalorder %s705_s17, 1 }
   0xd   : > { %p784_p6 = por %p136_p3, %p52_p0  ;;  %p143_p7 = scmp.lt.s32.totalorder %s705_s17, 3 }
   0xe   : > { %s962_s22 = scalar_select %p779_p4, 1, 0 }
   0xf   : > { %s963_s23 = scalar_select %p784_p6, 1, 0 }
  0x10   : > { %p789_p8 = pnand %p445_p5, %p143_p7  ;;  %s707_s25 = smov [#allocation5]  }
  0x11   : > { %s157_s26 = sshll.u32 %s707_s25, 4  ;;  %s32_s28 = sadd.s32 1, %s701_s16  ;;  %s158_s26 = int_to_ptr.vmem [resolvable:$true] %s157_s26 }
  0x12   : > { %s964_s24 = scalar_select %p789_p8, 1, 0 }
  0x13   : > { %p491_p9 = pneg %p789_p8  ;;  %s561_s4 = scalar_lea.hbm %s953_s1, 512 }
  0x14   : > { %p562_p12 = scmp.ne.s32.totalorder %s953_s1, %s561_s4  ;;  %p568_p5 = scmp.lt.u32.totalorder %s561_s4, %s953_s1 }
  0x15   : > { %p798_p11 = pnand %p491_p9, %p769_p1 }
  0x17   : > { %p563_p13 = pneg %p798_p11 }
  0x19   : > { %p564_p0 = pnand %p563_p13, %p562_p12 }
  0x1b   : > { %p565_p3 = pneg %p564_p0 }
  0x1d   : > { %p570_p7 = pnand %p568_p5, %p565_p3 }
  0x1f   : > { %573 = shalt.err (!%p570_p7)
}
  0x20   : > { %s574_s9 = scalar_lea.vmem %s158_s26, 512  ;;  %p582_p1 = scmp.lt.s32.totalorder %s158_s26, %s158_s26 }
  0x21   : > { %p575_p9 = scmp.ne.s32.totalorder %s158_s26, %s574_s9  ;;  %p583_p4 = scmp.lt.s32.totalorder %s574_s9, %s574_s9 }
  0x23   : > { %p577_p10 = pnand %p575_p9, %p563_p13  ;;  %p584_p8 = por %p583_p4, %p582_p1 }
  0x25   : > { %p578_p6 = pneg %p577_p10 }
  0x27   : > { %p585_p2 = pnand %p584_p8, %p578_p6 }
  0x29   : > { %588 = shalt.err (!%p585_p2)
}
  0x2a   : > { %s708_s10 = smov 128   ;;  %s709_s11 = smov 8  }
  0x2b   : > { %494 = dma.hbm_to_vmem [thread:$0]  (!%p798_p11), %s953_s1, 512, %s158_s26, [#allocation6], %s708_s10, %s708_s10, %s709_s11  }
  0x2c   : > { %p34_p1 = scmp.ge.s32.totalorder %s32_s28, 2  ;;  %s39_s25 = sadd.s32 1, %s693_s14 }
  0x2d   : > { %p46_p2 = scmp.ne.s32.totalorder %s693_s14, %s689_s13  ;;  %p47_p4 = scmp.eq.s32.totalorder %s705_s17, 0 }
  0x2e   : > { %s981_s28 = smov (%p34_p1, %s32_s28), 0  ;;  %p967_p8 = scmp.ne.s32.totalorder %s961_s21, 0 }
  0x2f   : > { %p825_p6 = por %p47_p4, %p46_p2  ;;  %s36_s27 = ssub.s32 %s701_s16, %s981_s28 }
  0x30   : > { %p831_p10 = por %p967_p8, %p46_p2  ;;  %p504_p12 = scmp.lt.s32.totalorder %s705_s17, 2 }
  0x31   : > { %p37_p11 = scmp.eq.s32.totalorder %s36_s27, 0  ;;  %s177_s26 = sand.u32 1, %s693_s14  }
  0x32   : > { %s449_s4 = sshll.u32 %s177_s26, 3  ;;  %s450_s6 = sshll.u32 %s701_s16, 7 }
  0x33   : > { %s840_s5 = scalar_select %p37_p11, %s693_s14, %s39_s25  }
  0x34   : > { %s846_s9 = scalar_lea.hbm %s952_s0, %s450_s6  ;;  %s181_s21 = scalar_lea.vmem [#allocation2], %s449_s4 }
  0x35   : > { %s188_s10 = sshll.u32 %s181_s21, 4  ;;  %p852_p13 = pnand %p504_p12, %p825_p6  ;;  %s848_s10 = int_to_ptr.vmem [resolvable:$true] %s188_s10 }
  0x36   : > { %s178_s18 = scalar_lea.sflag [#allocation3], %s177_s26  ;;  %s589_s19 = scalar_lea.hbm %s846_s9, 128 }
  0x37   : > { %p590_p0 = scmp.ne.s32.totalorder %s846_s9, %s589_s19  ;;  %p591_p3 = pneg %p852_p13 }
  0x38   : > { %s594_s4 = scalar_lea.hbm %s952_s0, 256  ;;  %p595_p9 = scmp.lt.u32.totalorder %s846_s9, %s952_s0 }
  0x39   : > { %p592_p5 = pnand %p591_p3, %p590_p0  ;;  %p596_p1 = scmp.lt.u32.totalorder %s594_s4, %s589_s19 }
  0x3a   : > { %p598_p4 = scmp.lt.u32.totalorder %s589_s19, %s846_s9 }
  0x3b   : > { %p593_p7 = pneg %p592_p5  ;;  %p597_p2 = por %p596_p1, %p595_p9 }
  0x3d   : > { %p599_p6 = por %p598_p4, %p597_p2 }
  0x3f   : > { %p600_p8 = pnand %p599_p6, %p593_p7 }
  0x41   : > { %603 = shalt.err (!%p600_p8)
}
  0x42   : > { %s604_s26 = scalar_lea.vmem %s848_s10, 128  ;;  %s710_s7 = smov [#allocation2]  }
  0x43   : > { %p605_p12 = scmp.ne.s32.totalorder %s848_s10, %s604_s26  ;;  %s609_s8 = sshll.u32 %s710_s7, 4  ;;  %s610_s8 = int_to_ptr.vmem [resolvable:$false] %s609_s8 }
  0x44   : > { %s611_s21 = scalar_lea.vmem %s610_s8, 256  ;;  %p612_p5 = scmp.lt.s32.totalorder %s848_s10, %s610_s8 }
  0x45   : > { %p607_p11 = pnand %p605_p12, %p591_p3  ;;  %p613_p9 = scmp.lt.s32.totalorder %s611_s21, %s604_s26 }
  0x47   : > { %p608_p0 = pneg %p607_p11  ;;  %p614_p1 = por %p613_p9, %p612_p5 }
  0x49   : > { %p615_p2 = pnand %p614_p1, %p608_p0 }
  0x4b   : > { %618 = shalt.err (!%p615_p2)
}
  0x4c   : > { %498 = dma.hbm_to_vmem [thread:$0]  (!%p852_p13), %s846_s9, 128, %s848_s10, %s178_s18  }
  0x4d   : > { %p970_p7 = scmp.ne.s32.totalorder %s964_s24, 0 }
  0x4e   : > { %s884_s19 = sand.u32 (!%p970_p7), 1, %s689_s13   ;;  %p971_p3 = scmp.ne.s32.totalorder (!%p970_p7), %s962_s22, 0 }
  0x4f   : > { %197 = sbr.rel (%p970_p7) target bundleno = 333 (0x14d), region = 32  ;;  %s452_s25 = sshll.u32 (!%p970_p7), %s884_s19, 3 }
  0x50   : > { %s200_s27 = scalar_lea.sflag (!%p970_p7), [#allocation3], %s884_s19  ;;  %s203_s4 = scalar_lea.vmem (!%p970_p7), [#allocation2], %s452_s25 }
  0x56   : > { %672 = dma.done.wait (%p971_p3), %s200_s27, 128  }
  0x57   : > { %674 = vsyncadd (%p971_p3), %s200_s27, 4294967168  ;;  %p972_p4 = scmp.ne.s32.totalorder %s960_s20, 0 }
  0x59   : > { %676 = dma.done.wait (%p972_p4), [#allocation6], 512  }
  0x5a   : > { %678 = vsyncadd (%p972_p4), [#allocation6], 4294966784  ;;  %v711_v0 = vmov 0.0|0.0   ;;  %vm712_vm0 = vmmov 0   ;;  %v713_v1 = vmov 0.0   ;;  %v237_v2 = vld [vmem:[#allocation5] sm:$0xff] }
  0x5b   : > { %477 = vmatprep.subr.bf16.mxu0 %v711_v0  ;;  %474 = vmatprep.mubr.msk.f32.mxu0 %vm712_vm0, %v713_v1  ;;  %v238_v3 = vld [vmem:[#allocation5 + $0x8] sm:$0xff]  ;;  %v239_v4 = vld [vmem:[#allocation5 + $0x10] sm:$0xff]  ;;  %v240_v6 = vld [vmem:[#allocation5 + $0x18] sm:$0xff]  ;;  %vm248_vm1 = vcmask 261120   ;;  %s458_s24 = sshll.u32 %s697_s15, 7  ;;  %s232_s9 = scalar_lea.vmem [#allocation7], %s452_s25 }
  0x5c   : > { %v478_v5 = vpack.c.bf16 %v238_v3, %v237_v2  ;;  %v481_v7 = vpack.c.bf16 %v240_v6, %v239_v4  ;;  %v236_v8 = vld [vmem:[%s203_s4] sm:$0xff]  ;;  %s340_s10 = sshll.u32 %s232_s9, 4  ;;  %s903_s29 = scalar_lea.hbm %s955_s3, %s458_s24  ;;  %s905_s10 = int_to_ptr.vmem [resolvable:$true] %s340_s10 }
  0x5d   : > { %v455_v9 = vld [vmem:[%s954_s2] ss:$0 sm:$0xff]  ;;  %s326_s6 = scalar_lea.sflag [#allocation4], %s884_s19  ;;  %s619_s26 = scalar_lea.vmem %s905_s10, 128 }
  0x5e   : > { %479 = vmatpush3.bf16.msra.mxu0 %v478_v5  ;;  %p620_p13 = scmp.ne.s32.totalorder %s905_s10, %s619_s26  ;;  %s714_s15 = smov [#allocation7]  }
  0x5f   : > { %480 = vmatprep.subr.bf16.mxu0 %v711_v0  ;;  %s623_s7 = sshll.u32 %s714_s15, 4  ;;  %s624_s7 = int_to_ptr.vmem [resolvable:$false] %s623_s7 }
  0x60   : > { %p621_p6 = pnand %p620_p13, %p831_p10  ;;  %s625_s8 = scalar_lea.vmem %s624_s7, 256 }
  0x61   : > { %p626_p12 = scmp.lt.s32.totalorder %s905_s10, %s624_s7  ;;  %p627_p11 = scmp.lt.s32.totalorder %s625_s8, %s619_s26 }
  0x62   : > { %482 = vmatpush3.bf16.msra.mxu0 %v481_v7  ;;  %p622_p8 = pneg %p621_p6 }
  0x63   : > { %p628_p0 = por %p627_p11, %p626_p12 }
  0x65   : > { %475 = vmatmul.mubr.msk.f32.vlgmr.msra.gmra.mrb[0].mxu0 %vm248_vm1, %v236_v8  ;;  %p629_p5 = pnand %p628_p0, %p622_p8 }
 0x138   : > { %v318_v10 = vpop.f32.mrb[0].mxu0 }
 0x139   : > { %v319_v11 = vadd.f32 %v455_v9, %v318_v10  ;;  %v476_v12 = vpop.f32.mrb[1].mxu0 }
 0x13b   : > { %v322_v13 = vmul.f32 0.2, %v319_v11 }
 0x13d   : > { %v323_v14 = vmax.f32 %v319_v11, %v322_v13 }
 0x13f   : > { %324 = vst [vmem:[%s232_s9] sm:$0xff] %v323_v14 }
 0x140   : > { %632 = shalt.err (!%p629_p5)
}
 0x141   : > { %s633_s21 = scalar_lea.hbm %s903_s29, 128  ;;  %s637_s27 = scalar_lea.hbm %s955_s3, 256 }
 0x142   : > { %p634_p9 = scmp.ne.s32.totalorder %s903_s29, %s633_s21  ;;  %p638_p7 = scmp.lt.u32.totalorder %s903_s29, %s955_s3 }
 0x143   : > { %p639_p3 = scmp.lt.u32.totalorder %s637_s27, %s633_s21  ;;  %p641_p13 = scmp.lt.u32.totalorder %s633_s21, %s903_s29 }
 0x144   : > { %p635_p1 = pnand %p634_p9, %p831_p10 }
 0x145   : > { %p640_p4 = por %p639_p3, %p638_p7 }
 0x146   : > { %p636_p2 = pneg %p635_p1 }
 0x147   : > { %p642_p6 = por %p641_p13, %p640_p4 }
 0x149   : > { %p643_p8 = pnand %p642_p6, %p636_p2 }
 0x14b   : > { %646 = shalt.err (!%p643_p8)
}
 0x14c   : > { %489 = dma.vmem_to_hbm [thread:$0]  (%p831_p10), %s905_s10, 128, %s903_s29, %s326_s6  }
 0x14d PF: > { %s352_s22 = sand.u32 1, %s685_s12   ;;  %p973_p12 = scmp.ne.s32.totalorder %s963_s23, 0 }
 0x14e   : > { %p974_p11 = scmp.ge.s32.totalorder %s705_s17, 2  ;;  %s353_s24 = scalar_lea.sflag [#allocation4], %s352_s22 }
 0x150   : > { %p500_p0 = pnand %p974_p11, %p973_p12 }
 0x152   : > { %680 = dma.done.wait (!%p500_p0), %s353_s24, 128  }
 0x153   : > { %682 = vsyncadd (!%p500_p0), %s353_s24, 4294967168  ;;  %s20_s17 = sadd.s32 1, %s705_s17   ;;  %s975_s12 = smov %s689_s13 }
 0x154   : > { %p17_p5 = scmp.ge.s32.totalorder %s20_s17, 4   ;;  %s976_s13 = smov %s693_s14 }
 0x155   : > { %s977_s14 = smov %s840_s5  ;;  %s978_s15 = smov %s701_s16 }
 0x156   : > { %s979_s16 = smov %s981_s28  ;;  %19 = sbr.rel (!%p17_p5) target bundleno = 7 (0x7), region = 85 }
 0x15d   :  { %358 = vsyncpa [#allocation3], 1 }
 0x15e   :  { %360 = vsyncpa [#allocation3 + $0x1], 1 }
 0x15f   :  { %361 = vsyncpa [#allocation6], 1 }
 0x160   :  { %362 = vsyncpa [#allocation4], 1 }
 0x161   :  { %364 = vsyncpa [#allocation4 + $0x1], 1 }

</bundles_post_ra>
